<compile_context>
chip_gen: v6e
topology: v6e:2x2x1
jax: 0.10.0
libtpu: 0.0.40
codegen_flags: <defaults>
</compile_context>

<pallas_src>
import jax
import jax.numpy as jnp
from jax.experimental import pallas as pl
from jax.experimental.pallas import tpu as pltpu

LANE = 128
SUBLANE = 8


# --------------------------------------------------------------------------
# Parameter preparation (done once, outside the per-evaluation hot path)
# --------------------------------------------------------------------------
def prepare_params(weight, bias, *, lane_multiple=LANE, param_dtype=None):
    """Transpose to (in, out) layout and zero-pad hidden to a lane multiple.

    weight: (H, H) in PyTorch [out_features, in_features] convention.
    bias:   (H,)
    Returns (w_io, b_row) with shapes (Hp, Hp) and (1, Hp), Hp = roundup(H, 128).
    Padded rows/cols are zero, so relu(0 + 0) = 0 and the padding stays inert
    even under repeated application (needed by the fused kernel).
    Pass param_dtype=jnp.bfloat16 on v6e/v7x to halve weight DMA bytes and use
    the native bf16 MXU path; accumulation stays f32 inside the kernels.
    """
    H_out, H_in = weight.shape
    assert H_out == H_in, "ODEFunc uses a square Linear layer"
    H = H_out
    Hp = ((H + lane_multiple - 1) // lane_multiple) * lane_multiple
    if param_dtype is not None:
        weight = weight.astype(param_dtype)
        bias = bias.astype(param_dtype)
    w_io = jnp.zeros((Hp, Hp), weight.dtype).at[:H, :H].set(weight.T)
    b_row = jnp.zeros((1, Hp), bias.dtype).at[0, :H].set(bias)
    return w_io, b_row


def _pick_tile_b(B, cap=512):
    """Largest divisor of B that is a multiple of 8 and <= cap; else B."""
    for cand in range(min(B, cap), 0, -1):
        if B % cand == 0 and cand % SUBLANE == 0:
            return cand
    return B


def _vmem_limit_bytes(working_set_bytes):
    # 2x for double buffering, 2x headroom; clamp so the request stays well
    # inside v7x's 64 MiB physical VMEM (v5e/v6e have 128 MiB).
    return int(min(max(4 * working_set_bytes, 8 << 20), 48 << 20))


# --------------------------------------------------------------------------
# Single-evaluation kernel: out = relu(h @ W_io + b)
# --------------------------------------------------------------------------
def _odefunc_kernel(h_ref, w_ref, b_ref, o_ref):
    # h_ref: (tile_b, H)   w_ref: (H, Hp) live slice of padded weight
    # b_ref: (1, Hp)       o_ref: (tile_b, Hp)  -- lane-dense store
    acc = jnp.dot(h_ref[...], w_ref[...], preferred_element_type=jnp.float32)
    acc = acc + b_ref[...].astype(jnp.float32)
    o_ref[...] = jnp.maximum(acc, 0.0).astype(o_ref.dtype)


def odefunc_forward(t, h, w_io, b_row, *, tile_b=None, slice_output=True):
    """relu(h @ W^T + b) with pre-prepared (padded, transposed) params.

    slice_output=False returns the padded (B, Hp) activation — use this inside
    a solver loop so the pad/slice HBM passes happen once per solve, not per
    evaluation.
    """
    del t  # unused, matches the PyTorch ODEFunc signature
    B, H = h.shape
    Hp = w_io.shape[1]

    if tile_b is None:
        tile_b = _pick_tile_b(B)
    if B % tile_b != 0:
        tile_b = B  # last-resort fallback (B with no usable divisor)
    grid = (B // tile_b,)

    itm = jnp.dtype(h.dtype).itemsize
    working = itm * (tile_b * H + tile_b * Hp) + jnp.dtype(w_io.dtype).itemsize * (H * Hp + Hp)

    out = pl.pallas_call(
        _odefunc_kernel,
        out_shape=jax.ShapeDtypeStruct((B, Hp), h.dtype),
        grid_spec=pltpu.PrefetchScalarGridSpec(
            num_scalar_prefetch=0,
            grid=grid,
            in_specs=[
                pl.BlockSpec((tile_b, H), lambda i: (i, 0)),   # h tile
                pl.BlockSpec((H, Hp), lambda i: (0, 0)),       # live weight rows only
                pl.BlockSpec((1, Hp), lambda i: (0, 0)),       # bias row
            ],
            out_specs=pl.BlockSpec((tile_b, Hp), lambda i: (i, 0)),
        ),
        compiler_params=pltpu.CompilerParams(
            dimension_semantics=("parallel",),
            vmem_limit_bytes=_vmem_limit_bytes(working),
        ),
        cost_estimate=pl.CostEstimate(
            flops=2 * B * H * Hp,
            transcendentals=0,
            bytes_accessed=itm * (B * H + B * Hp) + 4 * (H * Hp + Hp),
        ),
    )(h, w_io, b_row)
    return out[:, :H] if slice_output else out


# --------------------------------------------------------------------------
# Fused kernel: num_steps repeated evaluations h <- relu(h @ W_io + b) in ONE
# pallas_call.  h is carried as the fori_loop value (vregs for small tiles),
# the weight/bias are loaded once, and the (static) loop is fully unrolled.
# --------------------------------------------------------------------------
def _make_fused_kernel(num_steps):
    def kernel(h_ref, w_ref, b_ref, o_ref):
        # Hoisted out of the loop: weight load, bias cast + implicit broadcast.
        w = w_ref[...]
        b = b_ref[...].astype(jnp.float32)
        h0 = h_ref[...].astype(jnp.float32)

        def body(_, hh):
            acc = jnp.dot(hh, w, preferred_element_type=jnp.float32)
            return jnp.maximum(acc + b, 0.0)

        hN = jax.lax.fori_loop(0, num_steps, body, h0, unroll=True)
        o_ref[...] = hN.astype(o_ref.dtype)

    return kernel


def odefunc_fused(t, h, w_io, b_row, num_steps, *, tile_b=None):
    """Apply the module forward `num_steps` times inside one pallas_call.

    num_steps must be a Python int (static, unrolled inside the kernel).
    A real ODE solver would add its own update rule (e.g. h + dt*f(h)) in the
    same loop; repeated composition keeps the module's forward semantics exact.
    """
    del t
    num_steps = int(num_steps)
    B, H = h.shape
    Hp = w_io.shape[1]
    # One pad per fused call (covers all num_steps evaluations).
    h_pad = jnp.zeros((B, Hp), h.dtype).at[:, :H].set(h)

    if tile_b is None:
        tile_b = _pick_tile_b(B)
    if B % tile_b != 0:
        tile_b = B
    grid = (B // tile_b,)

    itm = jnp.dtype(h.dtype).itemsize
    witm = jnp.dtype(w_io.dtype).itemsize
    # f32 carry (4B) + in/out tiles + full padded weight + bias.
    working = 4 * tile_b * Hp + 2 * itm * tile_b * Hp + witm * (Hp * Hp + Hp)

    out = pl.pallas_call(
        _make_fused_kernel(num_steps),
        out_shape=jax.ShapeDtypeStruct((B, Hp), h.dtype),
        grid_spec=pltpu.PrefetchScalarGridSpec(
            num_scalar_prefetch=0,
            grid=grid,
            in_specs=[
                pl.BlockSpec((tile_b, Hp), lambda i: (i, 0)),  # h tile (padded)
                pl.BlockSpec((Hp, Hp), lambda i: (0, 0)),      # padded weight, fetched once
                pl.BlockSpec((1, Hp), lambda i: (0, 0)),       # bias row
            ],
            out_specs=pl.BlockSpec((tile_b, Hp), lambda i: (i, 0)),
        ),
        compiler_params=pltpu.CompilerParams(
            dimension_semantics=("parallel",),
            vmem_limit_bytes=_vmem_limit_bytes(working),
        ),
        cost_estimate=pl.CostEstimate(
            flops=2 * num_steps * B * Hp * Hp,
            transcendentals=0,
            bytes_accessed=2 * itm * B * Hp + witm * (Hp * Hp + Hp),
        ),
    )(h_pad, w_io, b_row)
    return out[:, :H]


# --------------------------------------------------------------------------
if __name__ == "__main__":
    hidden_dim = 32
    batch = 8

    key = jax.random.PRNGKey(0)
    k_h, k_w, k_b = jax.random.split(key, 3)

    # Deterministic synthetic parameters (nn.Linear-style uniform init bound).
    bound = 1.0 / (hidden_dim ** 0.5)
    weight = jax.random.uniform(k_w, (hidden_dim, hidden_dim),
                                minval=-bound, maxval=bound, dtype=jnp.float32)
    bias = jax.random.uniform(k_b, (hidden_dim,),
                              minval=-bound, maxval=bound, dtype=jnp.float32)
    h = jax.random.normal(k_h, (batch, hidden_dim), dtype=jnp.float32)
    t = jnp.float32(0.0)  # unused by the forward pass

    # One-time parameter prep (transpose + pad) — outside the hot path.
    # (Pass param_dtype=jnp.bfloat16 here on v6e/v7x for bf16 MXU operands.)
    w_io, b_row = prepare_params(weight, bias)

    # ---- single forward (matches the module's forward exactly) ----
    out = jax.block_until_ready(odefunc_forward(t, h, w_io, b_row))
    ref = jnp.maximum(h @ weight.T + bias, 0.0)
    assert out.shape == (batch, hidden_dim)
    assert jnp.allclose(out, ref, atol=1e-5, rtol=1e-5)

    # ---- fused repeated evaluation (solver-loop fusion demo) ----
    num_steps = 5
    out_fused = jax.block_until_ready(odefunc_fused(t, h, w_io, b_row, num_steps))
    ref_fused = h
    for _ in range(num_steps):
        ref_fused = jnp.maximum(ref_fused @ weight.T + bias, 0.0)
    assert out_fused.shape == (batch, hidden_dim)
    assert jnp.allclose(out_fused, ref_fused, atol=1e-4, rtol=1e-4)

    print("KERNEL_OK")
</pallas_src>

<mosaic_0001>
module attributes {stable_mosaic.version = 11 : i64} {
  func.func @_odefunc_kernel(%arg0: i32, %arg1: memref<8x32xf32, #tpu.memory_space<vmem>>, %arg2: memref<32x128xf32, #tpu.memory_space<vmem>>, %arg3: memref<1x128xf32, #tpu.memory_space<vmem>>, %arg4: memref<8x128xf32, #tpu.memory_space<vmem>>) attributes {dimension_semantics = [#tpu.dimension_semantics<parallel>], iteration_bounds = array<i64: 1>, scalar_prefetch = 0 : i64, scratch_operands = 0 : i64, tpu.core_type = #tpu.core_type<tc>, window_params = [{transform_indices = @transform_0, window_bounds = array<i64: 8, 32>}, {transform_indices = @transform_1, window_bounds = array<i64: 32, 128>}, {pipeline_mode = #tpu.pipeline_mode<synchronous>, transform_indices = @transform_2, window_bounds = array<i64: 1, 128>}, {transform_indices = @transform_3, window_bounds = array<i64: 8, 128>}]} {
    %c0 = arith.constant 0 : index
    %c0_0 = arith.constant 0 : index
    %0 = vector.load %arg1[%c0, %c0_0] : memref<8x32xf32, #tpu.memory_space<vmem>>, vector<8x32xf32>
    %c0_1 = arith.constant 0 : index
    %c0_2 = arith.constant 0 : index
    %1 = vector.load %arg2[%c0_1, %c0_2] : memref<32x128xf32, #tpu.memory_space<vmem>>, vector<32x128xf32>
    %cst = arith.constant dense<0.000000e+00> : vector<8x128xf32>
    %2 = tpu.matmul %0, %1, %cst {dimension_numbers = #tpu.dot_dimension_numbers<[1], [0], [0], [1], [0, 0, 1, 1], [], []>} : vector<8x32xf32>, vector<32x128xf32>, vector<8x128xf32> -> vector<8x128xf32>
    %c0_3 = arith.constant 0 : index
    %c0_4 = arith.constant 0 : index
    %3 = vector.load %arg3[%c0_3, %c0_4] : memref<1x128xf32, #tpu.memory_space<vmem>>, vector<1x128xf32>
    %4 = vector.broadcast %3 : vector<1x128xf32> to vector<8x128xf32>
    %5 = arith.addf %2, %4 : vector<8x128xf32>
    %cst_5 = arith.constant 0.000000e+00 : f32
    %6 = vector.broadcast %cst_5 : f32 to vector<8x128xf32>
    %7 = arith.maximumf %5, %6 : vector<8x128xf32>
    %c0_6 = arith.constant 0 : index
    %c0_7 = arith.constant 0 : index
    %8 = vector.load %arg4[%c0_6, %c0_7] : memref<8x128xf32, #tpu.memory_space<vmem>>, vector<8x128xf32>
    tpu.vector_store %arg4[%c0_6, %c0_7], %7 {strides = array<i32>} : memref<8x128xf32, #tpu.memory_space<vmem>>, vector<8x128xf32>,
    return
  }
  func.func @transform_0(%arg0: i32) -> (i32, i32) {
    %c0_i32 = arith.constant 0 : i32
    %c0_i32_0 = arith.constant 0 : i32
    return %arg0, %c0_i32 : i32, i32
  }
  func.func @transform_1(%arg0: i32) -> (i32, i32) {
    %c0_i32 = arith.constant 0 : i32
    %c0_i32_0 = arith.constant 0 : i32
    %c0_i32_1 = arith.constant 0 : i32
    return %c0_i32, %c0_i32_0 : i32, i32
  }
  func.func @transform_2(%arg0: i32) -> (i32, i32) {
    %c0_i32 = arith.constant 0 : i32
    %c0_i32_0 = arith.constant 0 : i32
    %c0_i32_1 = arith.constant 0 : i32
    return %c0_i32, %c0_i32_0 : i32, i32
  }
  func.func @transform_3(%arg0: i32) -> (i32, i32) {
    %c0_i32 = arith.constant 0 : i32
    %c0_i32_0 = arith.constant 0 : i32
    return %arg0, %c0_i32 : i32, i32
  }
}

</mosaic_0001>

<bundles_post_ra>
// kernel: tpu_custom_call.1
= control target key start
LH: loop header
LB: loop body
LE: loop exit
PB: predicated region body
PF: predicated region fallthrough
CT: control target
= control target key end

     0   :  { %8 = vsyncpa [#allocation3], 0  ;;  %s275_s0 = inlined_call_operand.hbm [shape: f32[8,32], index: 0, kind: input, shape index: {}]   ;;  %s276_s1 = inlined_call_operand.hbm [shape: f32[128,128], index: 1, kind: input, shape index: {}]   ;;  %s277_s2 = inlined_call_operand.vmem [shape: f32[1,128], index: 2, kind: input, shape index: {}]   ;;  %s278_s3 = inlined_call_operand.hbm [shape: f32[8,128], index: 3, kind: output, shape index: {}]  }
   0x1   :  { %9 = vsyncpa [#allocation6], 0 }
   0x2   :  { %10 = vsyncpa [#allocation4], 0  ;;  %s236_s12 = smov [#allocation2]   ;;  %s237_s14 = smov [#allocation5]  }
   0x3   :  { %s17_s13 = sshll.u32 %s236_s12, 4  ;;  %s26_s15 = sshll.u32 %s237_s14, 4  ;;  %s18_s13 = int_to_ptr.vmem [resolvable:$true] %s17_s13  ;;  %s27_s15 = int_to_ptr.vmem [resolvable:$true] %s26_s15 }
   0x4   :  { %s178_s16 = scalar_lea.vmem %s18_s13, 128  ;;  %p183_p1 = scmp.lt.s32.totalorder %s18_s13, %s18_s13 }
   0x5   :  { %p179_p0 = scmp.ne.s32.totalorder %s18_s13, %s178_s16  ;;  %p184_p2 = scmp.lt.s32.totalorder %s178_s16, %s178_s16 }
   0x7   :  { %p185_p3 = por %p184_p2, %p183_p1 }
   0x9   :  { %p186_p4 = pnand %p185_p3, %p179_p0 }
   0xb   :  { %189 = shalt.err (!%p186_p4)
}
   0xc   :  { %20 = dma.hbm_to_vmem [thread:$0]  %s275_s0, 128, %s18_s13, [#allocation3]  }
   0xd   :  { %s198_s19 = scalar_lea.vmem %s27_s15, 512  ;;  %p203_p6 = scmp.lt.s32.totalorder %s27_s15, %s27_s15 }
   0xe   :  { %p199_p5 = scmp.ne.s32.totalorder %s27_s15, %s198_s19  ;;  %p204_p7 = scmp.lt.s32.totalorder %s198_s19, %s198_s19 }
  0x10   :  { %p205_p8 = por %p204_p7, %p203_p6 }
  0x12   :  { %p206_p9 = pnand %p205_p8, %p199_p5 }
  0x14   :  { %209 = shalt.err (!%p206_p9)
}
  0x15   :  { %s238_s20 = smov 128   ;;  %s239_s21 = smov 8  }
  0x16   :  { %32 = dma.hbm_to_vmem [thread:$0]  %s276_s1, 512, %s27_s15, [#allocation6], %s238_s20, %s238_s20, %s239_s21  }
  0x17   :  { %230 = dma.done.wait [#allocation3], 128  }
  0x18   :  { %231 = vsyncadd [#allocation3], 4294967168 }
  0x19   :  { %232 = dma.done.wait [#allocation6], 512  }
  0x1a   :  { %233 = vsyncadd [#allocation6], 4294966784  ;;  %v240_v0 = vmov 0.0   ;;  %vm241_vm0 = vmmov 0   ;;  %v45_v1 = vld [vmem:[#allocation5 + $0x18] sm:$0xff]  ;;  %v44_v2 = vld [vmem:[#allocation5 + $0x10] sm:$0xff] }
  0x1b   :  { %152 = vmatprep.subr.mxu0 %v240_v0  ;;  %160 = vmatprep.mubr.msk.f32.mxu0 %vm241_vm0, %v240_v0  ;;  %v43_v3 = vld [vmem:[#allocation5 + $0x8] sm:$0xff]  ;;  %v42_v4 = vld [vmem:[#allocation5] sm:$0xff]  ;;  %v41_v5 = vld [vmem:[#allocation2] sm:$0xff]  ;;  %vm53_vm1 = vcmask 261120   ;;  %s242_s24 = smov [#allocation7]  }
  0x1c   :  { %153 = vmatpush3.msra.mxu0 %v45_v1  ;;  %v145_v6 = vld [vmem:[%s277_s2] ss:$0 sm:$0xff]  ;;  %s135_s25 = sshll.u32 %s242_s24, 4  ;;  %s136_s25 = int_to_ptr.vmem [resolvable:$true] %s135_s25 }
  0x1d   :  { %154 = vmatprep.subr.mxu0 %v240_v0  ;;  %s210_s26 = scalar_lea.vmem %s136_s25, 128  ;;  %p215_p11 = scmp.lt.s32.totalorder %s136_s25, %s136_s25 }
  0x1e   :  { %155 = vmatpush3.msra.mxu0 %v44_v2  ;;  %p211_p10 = scmp.ne.s32.totalorder %s136_s25, %s210_s26  ;;  %p216_p12 = scmp.lt.s32.totalorder %s210_s26, %s210_s26 }
  0x1f   :  { %156 = vmatprep.subr.mxu0 %v240_v0 }
  0x20   :  { %157 = vmatpush3.msra.mxu0 %v43_v3  ;;  %p217_p13 = por %p216_p12, %p215_p11 }
  0x21   :  { %158 = vmatprep.subr.mxu0 %v240_v0 }
  0x22   :  { %159 = vmatpush3.msra.mxu0 %v42_v4  ;;  %p218_p0 = pnand %p217_p13, %p211_p10 }
  0x23   :  { %161 = vmatmul.mubr.msk.f32.vlgmr.msra.gmra.mxu0 %vm53_vm1, %v41_v5 }
  0xe3   :  { %v123_v7 = vpop.f32.mrf.mxu0 }
  0xe4   :  { %v124_v8 = vadd.f32 %v145_v6, %v123_v7 }
  0xe5   :  { %v162_v9 = vpop.f32.mrf.mxu0 }
  0xe6   :  { %v127_v10 = vmax.f32 %v124_v8, 0.0 }
  0xe8   :  { %128 = vst [vmem:[#allocation7] sm:$0xff] %v127_v10 }
  0xe9   :  { %221 = shalt.err (!%p218_p0)
}
  0xea   :  { %138 = dma.vmem_to_hbm [thread:$0]  %s136_s25, 128, %s278_s3, [#allocation4]  }
  0xeb   :  { %234 = dma.done.wait [#allocation4], 128  }
  0xec   :  { %235 = vsyncadd [#allocation4], 4294967168 }
  0xed   :  { %142 = vsyncpa [#allocation3], 1 }
  0xee   :  { %143 = vsyncpa [#allocation6], 1 }
  0xef   :  { %144 = vsyncpa [#allocation4], 1 }

</bundles_post_ra>
